<compile_context>
chip_gen: v5e
topology: v5e:2x2
jax: 0.10.0
libtpu: 0.0.40
codegen_flags: <defaults>
</compile_context>

<pallas_src>
import jax
import jax.numpy as jnp
from jax.experimental import pallas as pl
from jax.experimental.pallas import tpu as pltpu

HIDDEN = 128
SUBLANE = 8
_TM_MAX = 1024  # 512-1024-row tiles already reach ~85-86% of HBM roofline


def _round_up(v, m):
    return ((v + m - 1) // m) * m


def _mlp_kernel(x_ref, w1_ref, b1_ref, w2_ref, b2_ref, o_ref):
    # x: (TM, in_size) -- cast in-register to the weight compute dtype.
    x = x_ref[...].astype(w1_ref.dtype)
    h = jnp.dot(x, w1_ref[...], preferred_element_type=jnp.float32)
    h = jnp.maximum(h + b1_ref[...], 0.0)             # bias-add + ReLU in f32
    y = jnp.dot(h.astype(w2_ref.dtype), w2_ref[...],
                preferred_element_type=jnp.float32)
    o_ref[...] = (y + b2_ref[...]).astype(o_ref.dtype)


def _vmem_limit_bytes():
    try:
        cap = pltpu.get_tpu_info().vmem_capacity_bytes
    except Exception:
        cap = 64 * 1024 * 1024  # conservative: v7x has 64 MiB per TensorCore
    return int(min(cap * 3 // 4, 96 * 1024 * 1024))


def _batch_tiling(batch, in_size, out_size, x_itemsize, c_itemsize, vmem_limit):
    # Resident operands (Pallas double-buffers them even with constant maps).
    weight_bytes = (in_size * HIDDEN * c_itemsize + HIDDEN * 4
                    + HIDDEN * out_size * c_itemsize + out_size * 4)
    budget = max(vmem_limit - 2 * weight_bytes - (4 << 20), 2 << 20)
    # Per batch-row: double-buffered x tile + double-buffered f32 out tile
    # + f32 hidden activation + its compute-dtype cast temp.
    per_row = (2 * in_size * x_itemsize + 2 * out_size * 4
               + HIDDEN * (4 + c_itemsize))
    tm_max = (budget // per_row) // SUBLANE * SUBLANE
    tm_max = max(SUBLANE, min(_TM_MAX, tm_max))
    num_tiles = pl.cdiv(batch, tm_max)
    if batch >= 256:
        num_tiles = max(num_tiles, 2)   # keep both v7x TensorCores busy
    tm = _round_up(pl.cdiv(batch, num_tiles), SUBLANE)
    return tm, tm * num_tiles


def value_function_forward(x, w1, b1, w2, b2, *,
                           compute_dtype=jnp.bfloat16, min_pallas_batch=0):
    """x: [B, in]; w1: [in, 128]; b1: [128]; w2: [128, out]; b2: [out].

    Returns [B, out] float32.  Set min_pallas_batch (e.g. 256) at call sites
    that run inference-sized batches to use a fused-XLA fallback instead.
    """
    B, in_size = x.shape
    hidden = w1.shape[1]
    out_size = w2.shape[1]
    assert hidden == HIDDEN

    if B < min_pallas_batch:
        # Small-batch fallback: one fused XLA MLP beats pad+launch+slice.
        xb = x.astype(compute_dtype)
        h = jnp.maximum(
            jnp.dot(xb, w1.astype(compute_dtype),
                    preferred_element_type=jnp.float32)
            + b1.astype(jnp.float32), 0.0)
        return (jnp.dot(h.astype(compute_dtype), w2.astype(compute_dtype),
                        preferred_element_type=jnp.float32)
                + b2.astype(jnp.float32))

    vmem_limit = _vmem_limit_bytes()
    c_item = jnp.dtype(compute_dtype).itemsize
    tm, b_pad = _batch_tiling(B, in_size, out_size,
                              jnp.dtype(x.dtype).itemsize, c_item, vmem_limit)

    if b_pad != B:
        # Minimal batch padding, done once directly in the compute dtype.
        xk = jnp.zeros((b_pad, in_size), compute_dtype).at[:B, :].set(
            x.astype(compute_dtype))
    else:
        xk = x  # no HBM copy; the kernel casts in-register

    w1c = w1.astype(compute_dtype)
    w2c = w2.astype(compute_dtype)
    b1r = b1.reshape(1, hidden).astype(jnp.float32)
    b2r = b2.reshape(1, out_size).astype(jnp.float32)

    grid = (b_pad // tm,)

    out = pl.pallas_call(
        _mlp_kernel,
        out_shape=jax.ShapeDtypeStruct((b_pad, out_size), jnp.float32),
        grid_spec=pltpu.PrefetchScalarGridSpec(
            num_scalar_prefetch=0,
            grid=grid,
            in_specs=[
                pl.BlockSpec((tm, in_size), lambda i: (i, 0)),       # x tile
                pl.BlockSpec((in_size, hidden), lambda i: (0, 0)),   # w1 resident
                pl.BlockSpec((1, hidden), lambda i: (0, 0)),         # b1 resident
                pl.BlockSpec((hidden, out_size), lambda i: (0, 0)),  # w2 resident
                pl.BlockSpec((1, out_size), lambda i: (0, 0)),       # b2 resident
            ],
            out_specs=pl.BlockSpec((tm, out_size), lambda i: (i, 0)),
        ),
        compiler_params=pltpu.CompilerParams(
            dimension_semantics=("parallel",),   # megacore split on v7x
            vmem_limit_bytes=vmem_limit,
        ),
    )(xk, w1c, b1r, w2c, b2r)

    return out if b_pad == B else out[:B]


def init_params(key, input_size, output_size, hidden=HIDDEN):
    """PyTorch-style uniform init: U(-1/sqrt(fan_in), 1/sqrt(fan_in))."""
    k1, k2, k3, k4 = jax.random.split(key, 4)
    bound1 = 1.0 / jnp.sqrt(jnp.float32(input_size))
    bound2 = 1.0 / jnp.sqrt(jnp.float32(hidden))
    w1 = jax.random.uniform(k1, (input_size, hidden), jnp.float32, -bound1, bound1)
    b1 = jax.random.uniform(k2, (hidden,), jnp.float32, -bound1, bound1)
    w2 = jax.random.uniform(k3, (hidden, output_size), jnp.float32, -bound2, bound2)
    b2 = jax.random.uniform(k4, (output_size,), jnp.float32, -bound2, bound2)
    return w1, b1, w2, b2


# TODO(synk): ValueFunction.act (host-side torch.tensor construction + device
# transfer) is runtime plumbing, not a kernel; only forward() is implemented.

if __name__ == "__main__":
    key = jax.random.PRNGKey(0)
    input_size, output_size = 32, 8
    batch = 2

    kx, kp = jax.random.split(key)
    x = jax.random.normal(kx, (batch, input_size), jnp.float32)
    w1, b1, w2, b2 = init_params(kp, input_size, output_size)

    fwd = jax.jit(value_function_forward,
                  static_argnames=("compute_dtype", "min_pallas_batch"))

    out = jax.block_until_ready(fwd(x, w1, b1, w2, b2))
    assert out.shape == (batch, output_size)

    # Reference with the same bf16-inputs / f32-accumulation recipe.
    xb = x.astype(jnp.bfloat16)
    h_ref = jnp.maximum(
        jnp.dot(xb, w1.astype(jnp.bfloat16),
                preferred_element_type=jnp.float32) + b1, 0.0)
    ref = jnp.dot(h_ref.astype(jnp.bfloat16), w2.astype(jnp.bfloat16),
                  preferred_element_type=jnp.float32) + b2
    assert jnp.allclose(out, ref, atol=1e-2, rtol=1e-2), (out, ref)

    # Full-f32 PyTorch semantics (looser tolerance for the bf16 compute path).
    ref_f32 = jnp.maximum(x @ w1 + b1, 0.0) @ w2 + b2
    assert jnp.allclose(out, ref_f32, atol=5e-2, rtol=5e-2)

    # A second, non-multiple-of-8 batch exercises the minimal-padding path.
    x2 = jax.random.normal(jax.random.PRNGKey(1), (50, input_size), jnp.float32)
    out2 = jax.block_until_ready(fwd(x2, w1, b1, w2, b2))
    ref2_f32 = jnp.maximum(x2 @ w1 + b1, 0.0) @ w2 + b2
    assert out2.shape == (50, output_size)
    assert jnp.allclose(out2, ref2_f32, atol=5e-2, rtol=5e-2)

    print("KERNEL_OK")
</pallas_src>

<mosaic_0001>
module attributes {stable_mosaic.version = 11 : i64} {
  func.func @_mlp_kernel(%arg0: i32, %arg1: memref<8x32xbf16, #tpu.memory_space<vmem>>, %arg2: memref<32x128xbf16, #tpu.memory_space<vmem>>, %arg3: memref<1x128xf32, #tpu.memory_space<vmem>>, %arg4: memref<128x8xbf16, #tpu.memory_space<vmem>>, %arg5: memref<1x8xf32, #tpu.memory_space<vmem>>, %arg6: memref<8x8xf32, #tpu.memory_space<vmem>>) attributes {dimension_semantics = [#tpu.dimension_semantics<parallel>], iteration_bounds = array<i64: 1>, scalar_prefetch = 0 : i64, scratch_operands = 0 : i64, tpu.core_type = #tpu.core_type<tc>, window_params = [{transform_indices = @transform_0, window_bounds = array<i64: 8, 32>}, {pipeline_mode = #tpu.pipeline_mode<synchronous>, transform_indices = @transform_1, window_bounds = array<i64: 32, 128>}, {pipeline_mode = #tpu.pipeline_mode<synchronous>, transform_indices = @transform_2, window_bounds = array<i64: 1, 128>}, {pipeline_mode = #tpu.pipeline_mode<synchronous>, transform_indices = @transform_3, window_bounds = array<i64: 128, 8>}, {pipeline_mode = #tpu.pipeline_mode<synchronous>, transform_indices = @transform_4, window_bounds = array<i64: 1, 8>}, {transform_indices = @transform_5, window_bounds = array<i64: 8, 8>}]} {
    %c0 = arith.constant 0 : index
    %c0_0 = arith.constant 0 : index
    %0 = vector.load %arg1[%c0, %c0_0] : memref<8x32xbf16, #tpu.memory_space<vmem>>, vector<8x32xbf16>
    %c0_1 = arith.constant 0 : index
    %c0_2 = arith.constant 0 : index
    %1 = vector.load %arg2[%c0_1, %c0_2] : memref<32x128xbf16, #tpu.memory_space<vmem>>, vector<32x128xbf16>
    %cst = arith.constant dense<0.000000e+00> : vector<8x128xf32>
    %2 = tpu.matmul %0, %1, %cst {dimension_numbers = #tpu.dot_dimension_numbers<[1], [0], [0], [1], [0, 0, 1, 1], [], []>} : vector<8x32xbf16>, vector<32x128xbf16>, vector<8x128xf32> -> vector<8x128xf32>
    %c0_3 = arith.constant 0 : index
    %c0_4 = arith.constant 0 : index
    %3 = vector.load %arg3[%c0_3, %c0_4] : memref<1x128xf32, #tpu.memory_space<vmem>>, vector<1x128xf32>
    %4 = vector.broadcast %3 : vector<1x128xf32> to vector<8x128xf32>
    %5 = arith.addf %2, %4 : vector<8x128xf32>
    %cst_5 = arith.constant 0.000000e+00 : f32
    %6 = vector.broadcast %cst_5 : f32 to vector<8x128xf32>
    %7 = arith.maximumf %5, %6 : vector<8x128xf32>
    %8 = arith.truncf %7 : vector<8x128xf32> to vector<8x128xbf16>
    %c0_6 = arith.constant 0 : index
    %c0_7 = arith.constant 0 : index
    %9 = vector.load %arg4[%c0_6, %c0_7] : memref<128x8xbf16, #tpu.memory_space<vmem>>, vector<128x8xbf16>
    %cst_8 = arith.constant dense<0.000000e+00> : vector<8x8xf32>
    %10 = tpu.matmul %8, %9, %cst_8 {dimension_numbers = #tpu.dot_dimension_numbers<[1], [0], [0], [1], [0, 0, 1, 1], [], []>} : vector<8x128xbf16>, vector<128x8xbf16>, vector<8x8xf32> -> vector<8x8xf32>
    %c0_9 = arith.constant 0 : index
    %c0_10 = arith.constant 0 : index
    %11 = vector.load %arg5[%c0_9, %c0_10] : memref<1x8xf32, #tpu.memory_space<vmem>>, vector<1x8xf32>
    %12 = vector.broadcast %11 : vector<1x8xf32> to vector<8x8xf32>
    %13 = arith.addf %10, %12 : vector<8x8xf32>
    %c0_11 = arith.constant 0 : index
    %c0_12 = arith.constant 0 : index
    %14 = vector.load %arg6[%c0_11, %c0_12] : memref<8x8xf32, #tpu.memory_space<vmem>>, vector<8x8xf32>
    tpu.vector_store %arg6[%c0_11, %c0_12], %13 {strides = array<i32>} : memref<8x8xf32, #tpu.memory_space<vmem>>, vector<8x8xf32>,
    return
  }
  func.func @transform_0(%arg0: i32) -> (i32, i32) {
    %c0_i32 = arith.constant 0 : i32
    %c0_i32_0 = arith.constant 0 : i32
    return %arg0, %c0_i32 : i32, i32
  }
  func.func @transform_1(%arg0: i32) -> (i32, i32) {
    %c0_i32 = arith.constant 0 : i32
    %c0_i32_0 = arith.constant 0 : i32
    %c0_i32_1 = arith.constant 0 : i32
    return %c0_i32, %c0_i32_0 : i32, i32
  }
  func.func @transform_2(%arg0: i32) -> (i32, i32) {
    %c0_i32 = arith.constant 0 : i32
    %c0_i32_0 = arith.constant 0 : i32
    %c0_i32_1 = arith.constant 0 : i32
    return %c0_i32, %c0_i32_0 : i32, i32
  }
  func.func @transform_3(%arg0: i32) -> (i32, i32) {
    %c0_i32 = arith.constant 0 : i32
    %c0_i32_0 = arith.constant 0 : i32
    %c0_i32_1 = arith.constant 0 : i32
    return %c0_i32, %c0_i32_0 : i32, i32
  }
  func.func @transform_4(%arg0: i32) -> (i32, i32) {
    %c0_i32 = arith.constant 0 : i32
    %c0_i32_0 = arith.constant 0 : i32
    %c0_i32_1 = arith.constant 0 : i32
    return %c0_i32, %c0_i32_0 : i32, i32
  }
  func.func @transform_5(%arg0: i32) -> (i32, i32) {
    %c0_i32 = arith.constant 0 : i32
    %c0_i32_0 = arith.constant 0 : i32
    return %arg0, %c0_i32 : i32, i32
  }
}

</mosaic_0001>

<bundles_post_ra>
// kernel: value_function_forward.1
= control target key start
LH: loop header
LB: loop body
LE: loop exit
PB: predicated region body
PF: predicated region fallthrough
CT: control target
= control target key end

     0   :  { %vm42_vm0 = vcmask 261120   ;;  %vm142_vm1 = vcmask 64512   ;;  %s273_s1 = inlined_call_operand.vmem [shape: bf16[32,128], index: 1, kind: input, shape index: {}]   ;;  %s274_s3 = inlined_call_operand.vmem [shape: bf16[128,8], index: 3, kind: input, shape index: {}]   ;;  %s275_s2 = inlined_call_operand.vmem [shape: f32[1,128], index: 2, kind: input, shape index: {}]   ;;  %s276_s0 = inlined_call_operand.vmem [shape: bf16[8,32], index: 0, kind: input, shape index: {}]   ;;  %s277_s4 = inlined_call_operand.vmem [shape: f32[1,8], index: 4, kind: input, shape index: {}]   ;;  %s278_s5 = inlined_call_operand.vmem [shape: f32[8,8], index: 5, kind: output, shape index: {}]  }
   0x1   :  { %v190_v0 = vld [vmem:[%s273_s1 + $0x8] sm:$0xff]  ;;  %v198_v1 = vld [vmem:[%s274_s3 + $0x38] sm:$0xff]  ;;  %v189_v2 = vld [vmem:[%s273_s1] sm:$0xff] }
   0x2   :  { %52 = vmatpush.bf16.msra.mxu0 %v190_v0  ;;  %129 = vmatpush.bf16.msra.mxu1 %v198_v1  ;;  %v197_v3 = vld [vmem:[%s274_s3 + $0x30] sm:$0xff]  ;;  %v21_v4 = vld [vmem:[%s276_s0] sm:$0xf]  ;;  %v196_v5 = vld [vmem:[%s274_s3 + $0x28] sm:$0xff] }
   0x3   :  { %v195_v6 = vld [vmem:[%s274_s3 + $0x20] sm:$0xff]  ;;  %v194_v7 = vld [vmem:[%s274_s3 + $0x18] sm:$0xff]  ;;  %v193_v8 = vld [vmem:[%s274_s3 + $0x10] sm:$0xff] }
   0x4   :  { %v192_v9 = vld [vmem:[%s274_s3 + $0x8] sm:$0xff]  ;;  %v191_v10 = vld [vmem:[%s274_s3] sm:$0xff] }
   0x5   :  { %v199_v11 = vld [vmem:[%s275_s2] ss:$0 sm:$0xff] }
   0x6   :  { %53 = vmatpush.bf16.msra.mxu0 %v189_v2  ;;  %130 = vmatpush.bf16.msra.mxu1 %v197_v3  ;;  %v200_v17 = vld [vmem:[%s277_s4] ss:$0 sm:$0xff] }
   0x9   :  { %156 = vmatmul.msk.bf16.vlgmr.msra.gmra.mxu0 %vm42_vm0, %v21_v4 }
   0xa   :  { %131 = vmatpush.bf16.msra.mxu1 %v196_v5 }
   0xe   :  { %132 = vmatpush.bf16.msra.mxu1 %v195_v6 }
  0x12   :  { %133 = vmatpush.bf16.msra.mxu1 %v194_v7 }
  0x16   :  { %134 = vmatpush.bf16.msra.mxu1 %v193_v8 }
  0x1a   :  { %135 = vmatpush.bf16.msra.mxu1 %v192_v9 }
  0x1e   :  { %136 = vmatpush.bf16.msra.mxu1 %v191_v10 }
  0x86   :  { %v55_v12 = vpop.f32.mrf.mxu0 }
  0x87   :  { %v56_v13 = vadd.f32 %v199_v11, %v55_v12 }
  0x89   :  { %v59_v14 = vmax.f32 %v56_v13, 0.0 }
  0x8b   :  { %v60_v15 = vpack.c.bf16 %v59_v14, %v59_v14 }
  0x8d   :  { %137 = vmatmul.bf16.vlgmr.msra.gmra.mxu1 %v60_v15 }
  0x8e   :  { %v57_v16 = vpop.f32.mrf.mxu0 }
 0x10a   :  { %v138_v18 = vpop.f32.mrf.mxu1 }
 0x10b   :  { %v139_v19 = vadd.f32 %v200_v17, %v138_v18 }
 0x10d   :  { %143 = vst.msk [vmem:[%s278_s5] sm:$0xff] %vm142_vm1, %v139_v19 }
 0x112   :  { %v140_v20 = vpop.f32.mrf.mxu1 }

</bundles_post_ra>
